<compile_context>
chip_gen: v6e
topology: v6e:2x2x1
jax: 0.10.0
libtpu: 0.0.40
codegen_flags: <defaults>
</compile_context>

<pallas_src>
import math
import functools

import jax
import jax.numpy as jnp
from jax.experimental import pallas as pl
from jax.experimental.pallas import tpu as pltpu


def _round_up(x: int, m: int) -> int:
    return ((x + m - 1) // m) * m


def _ffn_kernel(x_ref, w13_ref, w2_ref, o_ref, acc_ref):
    # x_ref:   (TM, Dp)        row-tile of flattened tokens (native dtype)
    # w13_ref: (Dp, 2*TDFF)    [W1.T | W3.T] slice for this DFF chunk
    # w2_ref:  (TDFF, Dp)      W2.T slice for this DFF chunk
    # o_ref:   (TM, Dp)        output row-tile (written on last DFF step)
    # acc_ref: (TM, Dp) f32    VMEM accumulator, resident across DFF steps
    k = pl.program_id(1)

    @pl.when(k == 0)
    def _init():
        acc_ref[...] = jnp.zeros_like(acc_ref)

    tdff = w2_ref.shape[0]
    cdt = w13_ref.dtype

    # Cast the resident x tile to the compute dtype once (cheap VPU work),
    # then one MXU matmul produces both h1 and h3 for this chunk (f32 accum).
    xt = x_ref[...].astype(cdt)
    h = jnp.dot(xt, w13_ref[...], preferred_element_type=jnp.float32)
    h1 = h[:, :tdff]
    h3 = h[:, tdff:]

    # Activation math stays in f32 (v5e has no bf16 VPU/EUP path).
    gated = (h1 * jax.nn.sigmoid(h1)) * h3

    # Partial contribution of this DFF chunk to the output, f32 accumulation.
    acc_ref[...] += jnp.dot(gated.astype(cdt), w2_ref[...],
                            preferred_element_type=jnp.float32)

    @pl.when(k == pl.num_programs(1) - 1)
    def _store():
        o_ref[...] = acc_ref[...].astype(o_ref.dtype)


def prepare_ffn_weights(w1, w2, w3, *, tdff=256, compute_dtype=jnp.bfloat16):
    """One-time weight preparation (do NOT call per forward pass).

    w1, w3: (DFF, D)   w2: (D, DFF)   (PyTorch Linear layout)
    Returns a dict with kernel-layout weights:
      w13: (Dp, nk*2*TDFF)  per-chunk [W1.T | W3.T] slabs, zero-padded
      w2t: (DFFp, Dp)       W2.T, zero-padded
    """
    DFF, D = (int(w1.shape[0]), int(w1.shape[1]))

    Dp = _round_up(D, 128)                               # lane-dense output / contraction
    tdff_eff = min(_round_up(tdff, 128), _round_up(DFF, 128))   # 128-aligned lane split
    DFFp = _round_up(DFF, tdff_eff)
    nk = DFFp // tdff_eff

    def pad2(a, rows, cols):
        return jnp.pad(a, ((0, rows - a.shape[0]), (0, cols - a.shape[1])))

    w1t = pad2(jnp.asarray(w1, compute_dtype).T, Dp, DFFp)   # (Dp, DFFp)
    w3t = pad2(jnp.asarray(w3, compute_dtype).T, Dp, DFFp)   # (Dp, DFFp)
    w2t = pad2(jnp.asarray(w2, compute_dtype).T, DFFp, Dp)   # (DFFp, Dp)

    # Interleave per-chunk slabs: chunk k -> [W1.T[:, k] | W3.T[:, k]].
    w13 = jnp.concatenate(
        [w1t.reshape(Dp, nk, tdff_eff), w3t.reshape(Dp, nk, tdff_eff)], axis=2
    ).reshape(Dp, nk * 2 * tdff_eff)

    return {
        "w13": w13,
        "w2t": w2t,
        "d_model": D,
        "dff": DFF,
        "tdff": int(tdff_eff),
    }


@functools.partial(jax.jit, static_argnames=("tdff", "tm", "vmem_limit_bytes"))
def _pos_wise_ffn_impl(x, w13, w2t, *, tdff, tm, vmem_limit_bytes):
    B, S, D = x.shape
    DFFp, Dp = w2t.shape
    nk = DFFp // tdff
    assert nk * tdff == DFFp and nk * 2 * tdff == w13.shape[1], \
        "weights were not produced by prepare_ffn_weights with this tdff"

    M = B * S
    # Token tiling: aim for the requested tm but guarantee >= 2 tiles on the
    # "parallel" axis whenever M allows (v7x has 2 TensorCores), while keeping
    # M padding minimal.
    n_tiles = max(1, -(-M // tm))
    if n_tiles == 1 and M > 16:
        n_tiles = 2
    tm_eff = max(16, _round_up(-(-M // n_tiles), 16))
    tm_eff = min(tm_eff, max(16, tm))
    Mp = _round_up(M, tm_eff)

    x2 = x.reshape(M, D)
    if Mp != M or Dp != D:
        x2 = jnp.pad(x2, ((0, Mp - M), (0, Dp - D)))

    if vmem_limit_bytes is None:
        # Double-buffered x / w13-chunk / w2-chunk / out, plus f32 accumulator.
        est = (2 * tm_eff * Dp * x.dtype.itemsize
               + 2 * Dp * 2 * tdff * w13.dtype.itemsize
               + 2 * tdff * Dp * w2t.dtype.itemsize
               + 2 * tm_eff * Dp * x.dtype.itemsize
               + tm_eff * Dp * 4)
        vmem_limit_bytes = min(100 * 1024 * 1024,
                               max(32 * 1024 * 1024, int(est * 1.25)))

    out = pl.pallas_call(
        _ffn_kernel,
        out_shape=jax.ShapeDtypeStruct((Mp, Dp), x.dtype),
        grid_spec=pltpu.PrefetchScalarGridSpec(
            num_scalar_prefetch=0,
            grid=(Mp // tm_eff, nk),          # (token tiles, DFF reduction) — reduction last
            in_specs=[
                pl.BlockSpec((tm_eff, Dp), lambda i, k: (i, 0)),      # x row-tile
                pl.BlockSpec((Dp, 2 * tdff), lambda i, k: (0, k)),    # [W1.T | W3.T] chunk
                pl.BlockSpec((tdff, Dp), lambda i, k: (k, 0)),        # W2.T chunk
            ],
            out_specs=pl.BlockSpec((tm_eff, Dp), lambda i, k: (i, 0)),
            scratch_shapes=[pltpu.VMEM((tm_eff, Dp), jnp.float32)],   # f32 accumulator
        ),
        compiler_params=pltpu.CompilerParams(
            dimension_semantics=("parallel", "arbitrary"),
            vmem_limit_bytes=vmem_limit_bytes,
        ),
    )(x2, w13, w2t)

    if Mp != M or Dp != D:
        out = out[:M, :D]
    return out.reshape(B, S, D)


def pos_wise_ffn(x, params, *, tm=512, vmem_limit_bytes=None):
    """x: (B, S, D). params: output of prepare_ffn_weights. Returns (B, S, D)."""
    return _pos_wise_ffn_impl(x, params["w13"], params["w2t"],
                              tdff=params["tdff"], tm=tm,
                              vmem_limit_bytes=vmem_limit_bytes)


# ---------------------------------------------------------------------------
# Parameter init matching the PyTorch module (trunc_normal, bias=False).
# ---------------------------------------------------------------------------
def _trunc_normal(key, shape, std):
    return std * jax.random.truncated_normal(key, -3.0, 3.0, shape, dtype=jnp.float32)


def init_params(key, embedding_dim):
    value = 8 * embedding_dim / 3
    dff = round(value / 64) * 64
    k1, k2, k3 = jax.random.split(key, 3)
    std1 = math.sqrt(2.0 / (embedding_dim + dff))
    std2 = math.sqrt(2.0 / (dff + embedding_dim))
    w1 = _trunc_normal(k1, (dff, embedding_dim), std1)   # Linear(d -> dff)
    w2 = _trunc_normal(k2, (embedding_dim, dff), std2)   # Linear(dff -> d)
    w3 = _trunc_normal(k3, (dff, embedding_dim), std1)   # Linear(d -> dff)
    return w1, w2, w3


def _reference(x, w1, w2, w3):
    h1 = x @ w1.T
    h3 = x @ w3.T
    return (h1 * jax.nn.sigmoid(h1) * h3) @ w2.T


if __name__ == "__main__":
    key = jax.random.PRNGKey(0)
    kx1, kp1, kx2, kp2 = jax.random.split(key, 4)

    # ---- Test 1: D=96 (dff=256), f32 compute, tdff=128 -> nk=2 chunks ----
    B, S, D = 2, 8, 96
    w1, w2, w3 = init_params(kp1, D)
    x = jax.random.normal(kx1, (B, S, D), dtype=jnp.float32)
    expected = jax.block_until_ready(_reference(x, w1, w2, w3))

    params_f32 = prepare_ffn_weights(w1, w2, w3, tdff=128,
                                     compute_dtype=jnp.float32)
    out = jax.block_until_ready(pos_wise_ffn(x, params_f32))
    assert out.shape == (B, S, D)
    assert jnp.allclose(out, expected, atol=2e-3, rtol=2e-3), "f32 nk=2 mismatch"

    # ---- Test 2: same x, default bf16 fast path (tdff=256 -> nk=1) ----
    params_bf16 = prepare_ffn_weights(w1, w2, w3)          # bf16 default
    out_bf16 = jax.block_until_ready(pos_wise_ffn(x, params_bf16))
    assert out_bf16.shape == (B, S, D)
    assert jnp.allclose(out_bf16, expected, atol=7e-2, rtol=7e-2), "bf16 mismatch"

    # ---- Test 3: D=192 (dff=512), ragged M=10, f32, default tdff=256 -> nk=2 ----
    B2, S2, D2 = 2, 5, 192
    w1b, w2b, w3b = init_params(kp2, D2)
    x2 = jax.random.normal(kx2, (B2, S2, D2), dtype=jnp.float32)
    expected2 = jax.block_until_ready(_reference(x2, w1b, w2b, w3b))

    params2 = prepare_ffn_weights(w1b, w2b, w3b, compute_dtype=jnp.float32)
    out2 = jax.block_until_ready(pos_wise_ffn(x2, params2))
    assert out2.shape == (B2, S2, D2)
    assert jnp.allclose(out2, expected2, atol=2e-3, rtol=2e-3), "f32 ragged-M mismatch"

    print("KERNEL_OK")
</pallas_src>

<mosaic_0001>
module attributes {stable_mosaic.version = 11 : i64} {
  func.func @_ffn_kernel(%arg0: i32, %arg1: i32, %arg2: memref<16x128xf32, #tpu.memory_space<vmem>>, %arg3: memref<128x256xf32, #tpu.memory_space<vmem>>, %arg4: memref<128x128xf32, #tpu.memory_space<vmem>>, %arg5: memref<16x128xf32, #tpu.memory_space<vmem>>, %arg6: memref<16x128xf32, #tpu.memory_space<vmem>>) attributes {dimension_semantics = [#tpu.dimension_semantics<parallel>, #tpu.dimension_semantics<arbitrary>], iteration_bounds = array<i64: 1, 2>, scalar_prefetch = 0 : i64, scratch_operands = 1 : i64, tpu.core_type = #tpu.core_type<tc>, window_params = [{transform_indices = @transform_0, window_bounds = array<i64: 16, 128>}, {transform_indices = @transform_1, window_bounds = array<i64: 128, 256>}, {transform_indices = @transform_2, window_bounds = array<i64: 128, 128>}, {transform_indices = @transform_3, window_bounds = array<i64: 16, 128>}]} {
    %c0_i32 = arith.constant 0 : i32
    %0 = arith.cmpi eq, %arg1, %c0_i32 : i32
    %1 = arith.extui %0 : i1 to i32
    %c0_i32_0 = arith.constant 0 : i32
    %2 = arith.cmpi ne, %1, %c0_i32_0 : i32
    scf.if %2 {
      %cst_13 = arith.constant 0.000000e+00 : f32
      %23 = vector.broadcast %cst_13 : f32 to vector<16x128xf32>
      %c0_14 = arith.constant 0 : index
      %c0_15 = arith.constant 0 : index
      %24 = vector.load %arg6[%c0_14, %c0_15] : memref<16x128xf32, #tpu.memory_space<vmem>>, vector<16x128xf32>
      tpu.vector_store %arg6[%c0_14, %c0_15], %23 {strides = array<i32>} : memref<16x128xf32, #tpu.memory_space<vmem>>, vector<16x128xf32>,
    } else {
    }
    %c0 = arith.constant 0 : index
    %c0_1 = arith.constant 0 : index
    %3 = vector.load %arg2[%c0, %c0_1] : memref<16x128xf32, #tpu.memory_space<vmem>>, vector<16x128xf32>
    %c0_2 = arith.constant 0 : index
    %c0_3 = arith.constant 0 : index
    %4 = vector.load %arg3[%c0_2, %c0_3] : memref<128x256xf32, #tpu.memory_space<vmem>>, vector<128x256xf32>
    %cst = arith.constant dense<0.000000e+00> : vector<16x256xf32>
    %5 = tpu.matmul %3, %4, %cst {dimension_numbers = #tpu.dot_dimension_numbers<[1], [0], [0], [1], [0, 0, 1, 1], [], []>} : vector<16x128xf32>, vector<128x256xf32>, vector<16x256xf32> -> vector<16x256xf32>
    %6 = vector.extract_strided_slice %5 {offsets = [0, 0], sizes = [16, 128], strides = [1, 1]} : vector<16x256xf32> to vector<16x128xf32>
    %7 = vector.extract_strided_slice %5 {offsets = [0, 128], sizes = [16, 128], strides = [1, 1]} : vector<16x256xf32> to vector<16x128xf32>
    %8 = arith.negf %6 : vector<16x128xf32>
    %9 = math.exp %8 : vector<16x128xf32>
    %cst_4 = arith.constant 1.000000e+00 : f32
    %10 = vector.broadcast %cst_4 : f32 to vector<16x128xf32>
    %11 = arith.addf %10, %9 : vector<16x128xf32>
    %12 = arith.divf %10, %11 : vector<16x128xf32>
    %13 = arith.mulf %6, %12 : vector<16x128xf32>
    %14 = arith.mulf %13, %7 : vector<16x128xf32>
    %c0_5 = arith.constant 0 : index
    %c0_6 = arith.constant 0 : index
    %15 = vector.load %arg6[%c0_5, %c0_6] : memref<16x128xf32, #tpu.memory_space<vmem>>, vector<16x128xf32>
    %c0_7 = arith.constant 0 : index
    %c0_8 = arith.constant 0 : index
    %16 = vector.load %arg4[%c0_7, %c0_8] : memref<128x128xf32, #tpu.memory_space<vmem>>, vector<128x128xf32>
    %cst_9 = arith.constant dense<0.000000e+00> : vector<16x128xf32>
    %17 = tpu.matmul %14, %16, %cst_9 {dimension_numbers = #tpu.dot_dimension_numbers<[1], [0], [0], [1], [0, 0, 1, 1], [], []>} : vector<16x128xf32>, vector<128x128xf32>, vector<16x128xf32> -> vector<16x128xf32>
    %18 = arith.addf %15, %17 : vector<16x128xf32>
    %c0_10 = arith.constant 0 : index
    %c0_11 = arith.constant 0 : index
    %19 = vector.load %arg6[%c0_10, %c0_11] : memref<16x128xf32, #tpu.memory_space<vmem>>, vector<16x128xf32>
    tpu.vector_store %arg6[%c0_10, %c0_11], %18 {strides = array<i32>} : memref<16x128xf32, #tpu.memory_space<vmem>>, vector<16x128xf32>,
    %c1_i32 = arith.constant 1 : i32
    %20 = arith.cmpi eq, %arg1, %c1_i32 : i32
    %21 = arith.extui %20 : i1 to i32
    %c0_i32_12 = arith.constant 0 : i32
    %22 = arith.cmpi ne, %21, %c0_i32_12 : i32
    scf.if %22 {
      %c0_13 = arith.constant 0 : index
      %c0_14 = arith.constant 0 : index
      %23 = vector.load %arg6[%c0_13, %c0_14] : memref<16x128xf32, #tpu.memory_space<vmem>>, vector<16x128xf32>
      %c0_15 = arith.constant 0 : index
      %c0_16 = arith.constant 0 : index
      %24 = vector.load %arg5[%c0_15, %c0_16] : memref<16x128xf32, #tpu.memory_space<vmem>>, vector<16x128xf32>
      tpu.vector_store %arg5[%c0_15, %c0_16], %23 {strides = array<i32>} : memref<16x128xf32, #tpu.memory_space<vmem>>, vector<16x128xf32>,
    } else {
    }
    return
  }
  func.func @transform_0(%arg0: i32, %arg1: i32) -> (i32, i32) {
    %c0_i32 = arith.constant 0 : i32
    %c0_i32_0 = arith.constant 0 : i32
    return %arg0, %c0_i32 : i32, i32
  }
  func.func @transform_1(%arg0: i32, %arg1: i32) -> (i32, i32) {
    %c0_i32 = arith.constant 0 : i32
    %c0_i32_0 = arith.constant 0 : i32
    return %c0_i32, %arg1 : i32, i32
  }
  func.func @transform_2(%arg0: i32, %arg1: i32) -> (i32, i32) {
    %c0_i32 = arith.constant 0 : i32
    %c0_i32_0 = arith.constant 0 : i32
    return %arg1, %c0_i32 : i32, i32
  }
  func.func @transform_3(%arg0: i32, %arg1: i32) -> (i32, i32) {
    %c0_i32 = arith.constant 0 : i32
    %c0_i32_0 = arith.constant 0 : i32
    return %arg0, %c0_i32 : i32, i32
  }
}

</mosaic_0001>

<bundles_post_ra>
// kernel: _pos_wise_ffn_impl.1
= control target key start
LH: loop header
LB: loop body
LE: loop exit
PB: predicated region body
PF: predicated region fallthrough
CT: control target
= control target key end

     0   :  { %8 = vsyncpa [#allocation4], 0  ;;  %s1096_s0 = inlined_call_operand.vmem [shape: f32[16,128], index: 0, kind: input, shape index: {}]   ;;  %s1097_s1 = inlined_call_operand.hbm [shape: f32[128,512], index: 1, kind: input, shape index: {}]   ;;  %s1098_s2 = inlined_call_operand.hbm [shape: f32[256,128], index: 2, kind: input, shape index: {}]   ;;  %s1099_s3 = inlined_call_operand.vmem [shape: f32[16,128], index: 3, kind: output, shape index: {}]  }
   0x1   :  { %10 = vsyncpa [#allocation4 + $0x1], 0 }
   0x2   :  { %11 = vsyncpa [#allocation6], 0 }
   0x3   :  { %13 = vsyncpa [#allocation6 + $0x1], 0  ;;  %s909_s12 = smov 0   ;;  %s911_s13 = smov 0  }
   0x4   :  { %s913_s14 = smov 0   ;;  %s915_s15 = smov 0  }
   0x5   :  { %s917_s16 = smov 0   ;;  %s919_s17 = smov 0  }
   0x6 LB: > { %s617_s18 = sadd.s32 4294967295, %s878_s17   ;;  %s28_s19 = sadd.s32 1, %s874_s16  ;;  %s878_s17 = sphi %s919_s17, %s19_s17   ;;  %s874_s16 = sphi %s917_s16, %s1108_s16   ;;  %s870_s15 = sphi %s915_s15, %s1107_s15   ;;  %s866_s14 = sphi %s913_s14, %s1106_s14   ;;  %s862_s13 = sphi %s911_s13, %s1105_s13   ;;  %s858_s12 = sphi %s909_s12, %s1104_s12  }
   0x7   : > { %p29_p0 = scmp.ge.s32.totalorder %s28_s19, 2  ;;  %s64_s20 = sadd.s32 1, %s866_s14 }
   0x8   : > { %p71_p1 = scmp.ne.s32.totalorder %s866_s14, %s862_s13  ;;  %p72_p2 = scmp.eq.s32.totalorder %s878_s17, 0 }
   0x9   : > { %s1110_s19 = smov (%p29_p0, %s28_s19), 0  ;;  %p77_p4 = scmp.ne.s32.totalorder %s862_s13, %s858_s12 }
   0xa   : > { %p945_p3 = por %p72_p2, %p71_p1  ;;  %s61_s22 = ssub.s32 %s874_s16, %s1110_s19 }
   0xb   : > { %p78_p5 = scmp.eq.s32.totalorder %s617_s18, 0  ;;  %p62_p6 = scmp.eq.s32.totalorder %s61_s22, 0 }
   0xc   : > { %p704_p8 = scmp.lt.s32.totalorder %s878_s17, 2  ;;  %s961_s25 = sand.u32 1, %s866_s14  }
   0xd   : > { %p952_p7 = por %p78_p5, %p77_p4  ;;  %s638_s26 = sshll.u32 %s874_s16, 8 }
   0xe   : > { %s958_s24 = scalar_select %p62_p6, %s866_s14, %s64_s20  }
   0xf   : > { %s621_s27 = sshll.u32 %s961_s25, 8  ;;  %s172_s30 = scalar_lea.hbm %s1097_s1, %s638_s26 }
  0x10   : > { %s166_s4 = scalar_lea.vmem [#allocation3], %s621_s27  ;;  %p970_p9 = pnand %p704_p8, %p945_p3 }
  0x11   : > { %s173_s5 = sshll.u32 %s166_s4, 4  ;;  %p627_p10 = scmp.ge.s32.totalorder %s878_s17, 1  ;;  %s174_s5 = int_to_ptr.vmem [resolvable:$true] %s173_s5 }
  0x12   : > { %s163_s7 = scalar_lea.sflag [#allocation4], %s961_s25  ;;  %p770_p11 = pneg %p970_p9 }
  0x13   : > { %s781_s8 = scalar_lea.vmem %s174_s5, 4096  ;;  %s880_s9 = smov [#allocation3]  }
  0x14   : > { %p782_p12 = scmp.ne.s32.totalorder %s174_s5, %s781_s8  ;;  %s786_s10 = sshll.u32 %s880_s9, 4  ;;  %s787_s10 = int_to_ptr.vmem [resolvable:$false] %s786_s10 }
  0x15   : > { %s788_s11 = scalar_lea.vmem %s787_s10, 8192  ;;  %p789_p1 = scmp.lt.s32.totalorder %s174_s5, %s787_s10 }
  0x16   : > { %p784_p13 = pnand %p782_p12, %p770_p11  ;;  %p790_p2 = scmp.lt.s32.totalorder %s788_s11, %s781_s8 }
  0x18   : > { %p785_p0 = pneg %p784_p13  ;;  %p791_p3 = por %p790_p2, %p789_p1 }
  0x1a   : > { %p792_p4 = pnand %p791_p3, %p785_p0 }
  0x1c   : > { %795 = shalt.err (!%p792_p4)
}
  0x1d   : > { %s881_s12 = smov 512   ;;  %s882_s18 = smov 256  }
  0x1e   : > { %s883_s20 = smov 16   ;;  %p202_p5 = scmp.lt.s32.totalorder %s878_s17, 3 }
  0x1f   : > { %700 = dma.hbm_to_vmem [thread:$0]  (!%p970_p9), %s172_s30, 4096, %s174_s5, %s163_s7, %s881_s12, %s882_s18, %s883_s20  }
  0x20   : > { %s624_s21 = sshll.u32 %s961_s25, 7  ;;  %s639_s22 = sshll.u32 %s874_s16, 11 }
  0x21   : > { %p988_p6 = pnand %p627_p10, %p202_p5  ;;  %s193_s29 = scalar_lea.hbm %s1098_s2, %s639_s22 }
  0x22   : > { %s187_s4 = scalar_lea.vmem [#allocation5], %s624_s21  ;;  %s184_s9 = scalar_lea.sflag [#allocation6], %s961_s25 }
  0x23   : > { %s194_s8 = sshll.u32 %s187_s4, 4  ;;  %s884_s30 = smov [#allocation5]   ;;  %s195_s8 = int_to_ptr.vmem [resolvable:$true] %s194_s8 }
  0x24   : > { %s809_s10 = scalar_lea.vmem %s195_s8, 2048  ;;  %s814_s5 = sshll.u32 %s884_s30, 4  ;;  %s815_s5 = int_to_ptr.vmem [resolvable:$false] %s814_s5 }
  0x25   : > { %p810_p8 = scmp.ne.s32.totalorder %s195_s8, %s809_s10  ;;  %s816_s7 = scalar_lea.vmem %s815_s5, 4096 }
  0x26   : > { %p817_p10 = scmp.lt.s32.totalorder %s195_s8, %s815_s5  ;;  %p818_p0 = scmp.lt.s32.totalorder %s816_s7, %s809_s10 }
  0x27   : > { %p812_p12 = pnand %p810_p8, %p770_p11 }
  0x28   : > { %p819_p1 = por %p818_p0, %p817_p10 }
  0x29   : > { %p813_p13 = pneg %p812_p12 }
  0x2b   : > { %p820_p2 = pnand %p819_p1, %p813_p13 }
  0x2d   : > { %823 = shalt.err (!%p820_p2)
}
  0x2e   : > { %s885_s11 = smov 128   ;;  %s886_s12 = smov 8  }
  0x2f   : > { %703 = dma.hbm_to_vmem [thread:$0]  (!%p970_p9), %s193_s29, 2048, %s195_s8, %s184_s9, %s885_s11, %s885_s11, %s886_s12  }
  0x30   : > { %206 = sbr.rel (%p988_p6) target bundleno = 538 (0x21a), region = 32  ;;  %s208_s25 = sand.u32 (!%p988_p6), 1, %s862_s13  }
  0x31   : > { %s628_s18 = sshll.u32 (!%p988_p6), %s208_s25, 8  ;;  %s209_s20 = scalar_lea.sflag (!%p988_p6), [#allocation4], %s208_s25 }
  0x32   : > { %s1004_s21 = scalar_lea.vmem (!%p988_p6), [#allocation3], %s628_s18 }
  0x35   : > { %849 = dma.done.wait (%p952_p7), %s209_s20, 4096  }
  0x36   : > { %851 = vsyncadd (%p952_p7), %s209_s20, 4294963200  ;;  %s629_s22 = sshll.u32 %s208_s25, 7  ;;  %s218_s27 = scalar_lea.sflag [#allocation6], %s208_s25 }
  0x37   : > { %s1010_s6 = scalar_lea.vmem [#allocation5], %s629_s22 }
  0x38   : > { %853 = dma.done.wait (%p952_p7), %s218_s27, 2048  }
  0x39   : > { %855 = vsyncadd (%p952_p7), %s218_s27, 4294965248  ;;  %p630_p9 = scmp.ne.s32.totalorder %s870_s15, 0 }
  0x3b   : > { %271 = sbr.rel (%p630_p9) target bundleno = 66 (0x42), region = 44 }
  0x40   : > { %v887_v0 = vmov 0.0  }
  0x41   : > { %272 = vst [vmem:[#allocation2] sm:$0xff] %v887_v0  ;;  %273 = vst [vmem:[#allocation2 + $0x8] sm:$0xff] %v887_v0 }
  0x42 PF: > { %v307_v1 = vld [vmem:[%s1004_s21 + $0xf8] sm:$0xff]  ;;  %v306_v2 = vld [vmem:[%s1004_s21 + $0xf0] sm:$0xff]  ;;  %v305_v3 = vld [vmem:[%s1004_s21 + $0xe8] sm:$0xff]  ;;  %v888_v5 = vmov 0.0   ;;  %p633_p7 = scmp.ne.s32.totalorder %s870_s15, 1 }
  0x43   : > { %308 = vmatprep.subr.mxu0 %v307_v1  ;;  %v304_v4 = vld [vmem:[%s1004_s21 + $0xe0] sm:$0xff]  ;;  %372 = vmatprep.mubr.f32.mxu0 %v888_v5  ;;  %v303_v6 = vld [vmem:[%s1004_s21 + $0xd8] sm:$0xff]  ;;  %v302_v7 = vld [vmem:[%s1004_s21 + $0xd0] sm:$0xff] }
  0x44   : > { %309 = vmatpush1.msra.mxu0 %v306_v2  ;;  %v301_v8 = vld [vmem:[%s1004_s21 + $0xc8] sm:$0xff]  ;;  %v300_v9 = vld [vmem:[%s1004_s21 + $0xc0] sm:$0xff]  ;;  %v299_v10 = vld [vmem:[%s1004_s21 + $0xb8] sm:$0xff] }
  0x45   : > { %310 = vmatprep.subr.mxu0 %v305_v3  ;;  %v298_v11 = vld [vmem:[%s1004_s21 + $0xb0] sm:$0xff]  ;;  %v297_v12 = vld [vmem:[%s1004_s21 + $0xa8] sm:$0xff]  ;;  %v296_v13 = vld [vmem:[%s1004_s21 + $0xa0] sm:$0xff] }
  0x46   : > { %311 = vmatpush1.msra.mxu0 %v304_v4  ;;  %v295_v14 = vld [vmem:[%s1004_s21 + $0x98] sm:$0xff]  ;;  %v294_v15 = vld [vmem:[%s1004_s21 + $0x90] sm:$0xff]  ;;  %v293_v16 = vld [vmem:[%s1004_s21 + $0x88] sm:$0xff] }
  0x47   : > { %312 = vmatprep.subr.mxu0 %v303_v6  ;;  %v292_v17 = vld [vmem:[%s1004_s21 + $0x80] sm:$0xff]  ;;  %v291_v18 = vld [vmem:[%s1004_s21 + $0x78] sm:$0xff]  ;;  %v290_v19 = vld [vmem:[%s1004_s21 + $0x70] sm:$0xff] }
  0x48   : > { %313 = vmatpush1.msra.mxu0 %v302_v7  ;;  %v289_v20 = vld [vmem:[%s1004_s21 + $0x68] sm:$0xff]  ;;  %v288_v21 = vld [vmem:[%s1004_s21 + $0x60] sm:$0xff]  ;;  %v287_v22 = vld [vmem:[%s1004_s21 + $0x58] sm:$0xff] }
  0x49   : > { %314 = vmatprep.subr.mxu0 %v301_v8  ;;  %v286_v23 = vld [vmem:[%s1004_s21 + $0x50] sm:$0xff]  ;;  %v285_v24 = vld [vmem:[%s1004_s21 + $0x48] sm:$0xff]  ;;  %v284_v25 = vld [vmem:[%s1004_s21 + $0x40] sm:$0xff] }
  0x4a   : > { %315 = vmatpush1.msra.mxu0 %v300_v9  ;;  %v283_v26 = vld [vmem:[%s1004_s21 + $0x38] sm:$0xff]  ;;  %v282_v27 = vld [vmem:[%s1004_s21 + $0x30] sm:$0xff]  ;;  %v281_v28 = vld [vmem:[%s1004_s21 + $0x28] sm:$0xff] }
  0x4b   : > { %316 = vmatprep.subr.mxu0 %v299_v10  ;;  %v280_v29 = vld [vmem:[%s1004_s21 + $0x20] sm:$0xff]  ;;  %v279_v30 = vld [vmem:[%s1004_s21 + $0x18] sm:$0xff]  ;;  %v278_v31 = vld [vmem:[%s1004_s21 + $0x10] sm:$0xff] }
  0x4c   : > { %317 = vmatpush1.msra.mxu0 %v298_v11  ;;  %v277_v32 = vld [vmem:[%s1004_s21 + $0x8] sm:$0xff]  ;;  %v276_v33 = vld [vmem:[%s1004_s21] sm:$0xff]  ;;  %v274_v34 = vld [vmem:[%s1096_s0] sm:$0xff] }
  0x4d   : > { %318 = vmatprep.subr.mxu0 %v297_v12  ;;  %v275_v35 = vld [vmem:[%s1096_s0 + $0x8] sm:$0xff]  ;;  %v417_v37 = vld [vmem:[%s1010_s6 + $0x70] sm:$0xff]  ;;  %v416_v38 = vld [vmem:[%s1010_s6 + $0x68] sm:$0xff] }
  0x4e   : > { %319 = vmatpush1.msra.mxu0 %v296_v13  ;;  %v418_v36 = vld [vmem:[%s1010_s6 + $0x78] sm:$0xff]  ;;  %v415_v39 = vld [vmem:[%s1010_s6 + $0x60] sm:$0xff]  ;;  %v413_v41 = vld [vmem:[%s1010_s6 + $0x50] sm:$0xff] }
  0x4f   : > { %320 = vmatprep.subr.mxu0 %v295_v14  ;;  %658 = vmatprep.subr.mxu1 %v418_v36  ;;  %v414_v40 = vld [vmem:[%s1010_s6 + $0x58] sm:$0xff]  ;;  %v412_v42 = vld [vmem:[%s1010_s6 + $0x48] sm:$0xff]  ;;  %v411_v43 = vld [vmem:[%s1010_s6 + $0x40] sm:$0xff] }
  0x50   : > { %321 = vmatpush1.msra.mxu0 %v294_v15  ;;  %659 = vmatpush3.msra.mxu1 %v418_v36  ;;  %v410_v44 = vld [vmem:[%s1010_s6 + $0x38] sm:$0xff]  ;;  %v409_v45 = vld [vmem:[%s1010_s6 + $0x30] sm:$0xff]  ;;  %v408_v46 = vld [vmem:[%s1010_s6 + $0x28] sm:$0xff] }
  0x51   : > { %322 = vmatprep.subr.mxu0 %v293_v16  ;;  %660 = vmatprep.subr.mxu1 %v417_v37  ;;  %v407_v47 = vld [vmem:[%s1010_s6 + $0x20] sm:$0xff]  ;;  %v406_v48 = vld [vmem:[%s1010_s6 + $0x18] sm:$0xff]  ;;  %v405_v49 = vld [vmem:[%s1010_s6 + $0x10] sm:$0xff] }
  0x52   : > { %323 = vmatpush1.msra.mxu0 %v292_v17  ;;  %661 = vmatpush3.msra.mxu1 %v417_v37  ;;  %v404_v50 = vld [vmem:[%s1010_s6 + $0x8] sm:$0xff]  ;;  %v403_v51 = vld [vmem:[%s1010_s6] sm:$0xff]  ;;  %v402_v4 = vld [vmem:[#allocation2 + $0x8] sm:$0xff] }
  0x53   : > { %324 = vmatprep.subr.mxu0 %v291_v18  ;;  %662 = vmatprep.subr.mxu1 %v416_v38  ;;  %v401_v6 = vld [vmem:[#allocation2] sm:$0xff] }
  0x54   : > { %325 = vmatpush1.msra.mxu0 %v290_v19  ;;  %663 = vmatpush3.msra.mxu1 %v416_v38 }
  0x55   : > { %326 = vmatprep.subr.mxu0 %v289_v20  ;;  %664 = vmatprep.subr.mxu1 %v415_v39 }
  0x56   : > { %327 = vmatpush1.msra.mxu0 %v288_v21  ;;  %665 = vmatpush3.msra.mxu1 %v415_v39 }
  0x57   : > { %328 = vmatprep.subr.mxu0 %v287_v22  ;;  %666 = vmatprep.subr.mxu1 %v414_v40 }
  0x58   : > { %329 = vmatpush1.msra.mxu0 %v286_v23  ;;  %667 = vmatpush3.msra.mxu1 %v414_v40 }
  0x59   : > { %330 = vmatprep.subr.mxu0 %v285_v24  ;;  %668 = vmatprep.subr.mxu1 %v413_v41 }
  0x5a   : > { %331 = vmatpush1.msra.mxu0 %v284_v25  ;;  %669 = vmatpush3.msra.mxu1 %v413_v41 }
  0x5b   : > { %332 = vmatprep.subr.mxu0 %v283_v26  ;;  %670 = vmatprep.subr.mxu1 %v412_v42 }
  0x5c   : > { %333 = vmatpush1.msra.mxu0 %v282_v27  ;;  %671 = vmatpush3.msra.mxu1 %v412_v42 }
  0x5d   : > { %334 = vmatprep.subr.mxu0 %v281_v28  ;;  %672 = vmatprep.subr.mxu1 %v411_v43 }
  0x5e   : > { %335 = vmatpush1.msra.mxu0 %v280_v29  ;;  %673 = vmatpush3.msra.mxu1 %v411_v43 }
  0x5f   : > { %336 = vmatprep.subr.mxu0 %v279_v30  ;;  %674 = vmatprep.subr.mxu1 %v410_v44 }
  0x60   : > { %337 = vmatpush1.msra.mxu0 %v278_v31  ;;  %675 = vmatpush3.msra.mxu1 %v410_v44 }
  0x61   : > { %338 = vmatprep.subr.mxu0 %v277_v32  ;;  %676 = vmatprep.subr.mxu1 %v409_v45 }
  0x62   : > { %339 = vmatpush1.msra.mxu0 %v276_v33  ;;  %677 = vmatpush3.msra.mxu1 %v409_v45 }
  0x63   : > { %373 = vmatmul.mubr.f32.vlgmr.msra.gmra.mxu0 %v274_v34  ;;  %678 = vmatprep.subr.mxu1 %v408_v46 }
  0x64   : > { %378 = vmatprep.mubr.f32.mxu0 %v888_v5  ;;  %679 = vmatpush3.msra.mxu1 %v408_v46 }
  0x65   : > { %680 = vmatprep.subr.mxu1 %v407_v47 }
  0x66   : > { %681 = vmatpush3.msra.mxu1 %v407_v47 }
  0x67   : > { %379 = vmatmul.mubr.f32.gmra.mxu0 %v275_v35  ;;  %682 = vmatprep.subr.mxu1 %v406_v48 }
  0x68   : > { %683 = vmatpush3.msra.mxu1 %v406_v48 }
  0x69   : > { %684 = vmatprep.subr.mxu1 %v405_v49 }
  0x6a   : > { %685 = vmatpush3.msra.mxu1 %v405_v49 }
  0x6b   : > { %686 = vmatprep.subr.mxu1 %v404_v50 }
  0x6c   : > { %687 = vmatpush3.msra.mxu1 %v404_v50 }
  0x6d   : > { %688 = vmatprep.subr.mxu1 %v403_v51 }
  0x6e   : > { %689 = vmatpush3.msra.mxu1 %v403_v51 }
 0x123   : > { %v374_v52 = vpop.f32.mrf.mxu0 }
 0x124   : > { %v631_v53 = vmul.f32 -1.442695, %v374_v52 }
 0x125   : > { %v376_v54 = vpop.f32.mrf.mxu0 }
 0x126   : > { %760 = vpow2.f32 %v631_v53 }
 0x127   : > { %v380_v55 = vpop.f32.mrf.mxu0 }
 0x128   : > { %v632_v56 = vmul.f32 -1.442695, %v380_v55 }
 0x129   : > { %v382_v2 = vpop.f32.mrf.mxu0 }
 0x12a   : > { %762 = vpow2.f32 %v632_v56 }
 0x133   : > { %v761_v57 = vpop.eup %760 }
 0x134   : > { %v391_v58 = vadd.f32 1.0, %v761_v57 }
 0x136   : > { %764 = vrcp.f32 %v391_v58 }
 0x137   : > { %v763_v59 = vpop.eup %762 }
 0x138   : > { %v392_v60 = vadd.f32 1.0, %v763_v59 }
 0x13a   : > { %766 = vrcp.f32 %v392_v60 }
 0x143   : > { %v765_v61 = vpop.eup %764 }
 0x144   : > { %v397_v62 = vmul.f32 %v765_v61, %v374_v52 }
 0x146   : > { %v399_v63 = vmul.f32 %v397_v62, %v376_v54 }
 0x147   : > { %v767_v0 = vpop.eup %766 }
 0x148   : > { %v398_v1 = vmul.f32 %v767_v0, %v380_v55  ;;  %690 = vmatprep.mubr.f32.mxu1 %v399_v63 }
 0x14a   : > { %v400_v3 = vmul.f32 %v398_v1, %v382_v2 }
 0x14c   : > { %691 = vmatmul.mubr.f32.vlgmr.msra.gmra.mxu1 %v400_v3 }
 0x20c   : > { %v692_v5 = vpop.f32.mrf.mxu1 }
 0x20d   : > { %v495_v7 = vadd.f32 %v692_v5, %v402_v4  ;;  %501 = sbr.rel (%p633_p7) target bundleno = 538 (0x21a), region = 48 }
 0x20e   : > { %v485_v8 = vpop.f32.mrf.mxu1 }
 0x20f   : > { %497 = vst [vmem:[#allocation2 + $0x8] sm:$0xff] %v495_v7  ;;  %v494_v9 = vadd.f32 %v485_v8, %v401_v6 }
 0x211   : > { %496 = vst [vmem:[#allocation2] sm:$0xff] %v494_v9 }
 0x216   : > { %v503_v11 = vld [vmem:[#allocation2 + $0x8] sm:$0xff] }
 0x217   : > { %505 = vst [vmem:[%s1099_s3 + $0x8] sm:$0xff] %v503_v11 }
 0x218   : > { %v502_v10 = vld [vmem:[#allocation2] sm:$0xff] }
 0x219   : > { %504 = vst [vmem:[%s1099_s3] sm:$0xff] %v502_v10 }
 0x21a PF: > { %s19_s17 = sadd.s32 1, %s878_s17   ;;  %s1104_s12 = smov %s862_s13 }
 0x21b   : > { %p16_p11 = scmp.ge.s32.totalorder %s19_s17, 4   ;;  %s1105_s13 = smov %s866_s14 }
 0x21c   : > { %s1106_s14 = smov %s958_s24  ;;  %s1107_s15 = smov %s874_s16 }
 0x21d   : > { %s1108_s16 = smov %s1110_s19  ;;  %18 = sbr.rel (!%p16_p11) target bundleno = 6 (0x6), region = 96 }
 0x222   :  { %528 = vsyncpa [#allocation4], 1 }
 0x223   :  { %530 = vsyncpa [#allocation4 + $0x1], 1 }
 0x224   :  { %531 = vsyncpa [#allocation6], 1 }
 0x225   :  { %533 = vsyncpa [#allocation6 + $0x1], 1 }

</bundles_post_ra>
